<compile_context>
chip_gen: v7x
topology: tpu7x:2x2x1
jax: 0.10.0
libtpu: 0.0.40
codegen_flags: <defaults>
</compile_context>

<pallas_src>
import math
import functools

import jax
import jax.numpy as jnp
from jax.experimental import pallas as pl
from jax.experimental.pallas import tpu as pltpu

MAX_SEQ_SIZE = 64


def make_positional_table(max_len: int, n_embed: int, dtype=jnp.float32):
    """Deterministic sinusoidal table, identical to the PyTorch __init__."""
    position = jnp.arange(0.0, max_len, dtype=jnp.float32)[:, None]          # (L, 1)
    div_term = jnp.exp(
        jnp.arange(0.0, n_embed, 2, dtype=jnp.float32)
        * -(math.log(10000.0) / n_embed)
    )                                                                          # (E/2,)
    angles = position * div_term                                               # (L, E/2)
    pe = jnp.zeros((max_len, n_embed), dtype=jnp.float32)
    pe = pe.at[:, 0::2].set(jnp.sin(angles))
    pe = pe.at[:, 1::2].set(jnp.cos(angles))
    return pe.astype(dtype)                                                    # (L, E)


def _pos_enc_kernel(emb_ref, pe_ref, out_ref, *, scale, keep_threshold, seed):
    # emb_ref/out_ref: (Bb, T*E) block of rows; pe_ref: (1, T*E) shared row.
    # `scale` already contains sqrt(n_embed) (and 1/(1-p) when dropout is on);
    # pe_ref was pre-scaled by 1/(1-p) in the wrapper, so the hot path is one
    # fused multiply-add per vreg.
    y = emb_ref[...] * scale + pe_ref[...]

    if keep_threshold is not None:
        # Inverted dropout (same distribution as nn.Dropout, not bit-identical
        # to torch's RNG).  NOTE: the realized mask depends on the row tiling
        # because the seed is per grid step.
        pltpu.prng_seed(seed + pl.program_id(0))
        bits = pltpu.prng_random_bits(y.shape)
        if bits.dtype != jnp.uint32:
            bits = pltpu.bitcast(bits, jnp.uint32)
        keep = bits >= jnp.uint32(keep_threshold)
        y = jnp.where(keep, y, jnp.zeros_like(y))

    out_ref[...] = y.astype(out_ref.dtype)


def _pick_row_block(batch, row_bytes, target_tile_bytes=4 * 1024 * 1024):
    """Rows per grid step: large, lane-dense tiles whose sublane dim is either
    a multiple of 8 or the full batch (satisfies TPU tiling rules)."""
    bb = max(1, min(batch, target_tile_bytes // max(row_bytes, 1)))
    if bb < batch:
        bb = max(8, (bb // 8) * 8)
        if bb >= batch:
            bb = batch
    # Split into >=2 grid steps when batch is large enough, so both v7x
    # TensorCores get work on the "parallel" axis.
    if batch >= 16 and bb == batch:
        bb = max(8, (batch // 2 // 8) * 8)
    return bb


def positional_encoding(emb, pe_table, n_embed, dropout_prob=None, seed=0,
                        donate_input=False):
    """emb: (B, T, E) -> (B, T, E) = emb * sqrt(E) + pe[:T] (+ dropout)."""
    B, T, E = emb.shape
    assert E == n_embed
    assert pe_table.shape[0] >= T and pe_table.shape[1] == E
    dtype = emb.dtype

    scale = math.sqrt(n_embed)
    pe = pe_table[:T, :].astype(jnp.float32)

    keep_threshold = None
    if dropout_prob is not None and dropout_prob > 0.0:
        if dropout_prob >= 1.0:
            # nn.Dropout(p=1.0) zeros everything in training mode.
            return jnp.zeros_like(emb)
        inv_keep = 1.0 / (1.0 - dropout_prob)
        scale = scale * inv_keep          # fold 1/(1-p) into the emb scale
        pe = pe * inv_keep                # ... and into the PE table
        # TODO(synk): for p extremely close to 1.0 the uint32 threshold loses
        # the last ulp of precision (clamped below).
        keep_threshold = min(int(dropout_prob * float(2 ** 32)), 2 ** 32 - 1)

    # Lane-dense layout: (B, T, E) -> (B, T*E); PE becomes one shared row.
    TE = T * E
    x = emb.reshape(B, TE)
    pe_flat = pe.reshape(1, TE).astype(dtype)   # cast once in the wrapper

    row_bytes = TE * x.dtype.itemsize
    bb = _pick_row_block(B, row_bytes)
    grid = (pl.cdiv(B, bb),)

    kernel = functools.partial(
        _pos_enc_kernel,
        scale=scale,
        keep_threshold=keep_threshold,
        seed=seed,
    )

    out_flat = pl.pallas_call(
        kernel,
        out_shape=jax.ShapeDtypeStruct((B, TE), dtype),
        grid=grid,
        in_specs=[
            pl.BlockSpec((bb, TE), lambda b: (b, 0)),   # rows of emb
            pl.BlockSpec((1, TE), lambda b: (0, 0)),    # shared PE row
        ],
        out_specs=pl.BlockSpec((bb, TE), lambda b: (b, 0)),
        compiler_params=pltpu.CompilerParams(
            dimension_semantics=("parallel",),
            vmem_limit_bytes=48 * 1024 * 1024,   # headroom on v7x's 64 MiB
        ),
        # Optionally reuse the emb buffer as the output (caller must not need
        # emb afterwards).
        input_output_aliases=({0: 0} if donate_input else {}),
    )(x, pe_flat)

    return out_flat.reshape(B, T, E)


if __name__ == "__main__":
    # --- small shape implied by the module's forward: (batch, seq, n_embed) ---
    batch, seq, n_embed = 2, 8, 32
    key = jax.random.PRNGKey(0)
    emb = jax.random.normal(key, (batch, seq, n_embed), dtype=jnp.float32)
    pe_table = make_positional_table(MAX_SEQ_SIZE, n_embed)

    out = positional_encoding(emb, pe_table, n_embed, dropout_prob=None)
    out = jax.block_until_ready(out)

    ref = emb * math.sqrt(n_embed) + pe_table[None, :seq, :]
    assert out.shape == (batch, seq, n_embed)
    assert out.dtype == emb.dtype
    assert jnp.allclose(out, ref, atol=1e-5, rtol=1e-5)

    # --- second check: larger batch exercises the multi-step (>=2) grid with
    #     multiple-of-8 row tiles (megacore-friendly path) ---
    batch2, seq2, n_embed2 = 32, 64, 256
    emb2 = jax.random.normal(jax.random.PRNGKey(1),
                             (batch2, seq2, n_embed2), dtype=jnp.float32)
    pe_table2 = make_positional_table(MAX_SEQ_SIZE, n_embed2)
    out2 = jax.block_until_ready(
        positional_encoding(emb2, pe_table2, n_embed2, dropout_prob=None))
    ref2 = emb2 * math.sqrt(n_embed2) + pe_table2[None, :seq2, :]
    assert jnp.allclose(out2, ref2, atol=1e-4, rtol=1e-5)

    print("KERNEL_OK")
</pallas_src>

<mosaic_0001>
module attributes {stable_mosaic.version = 11 : i64} {
  func.func @_pos_enc_kernel(%arg0: i32, %arg1: memref<2x256xf32, #tpu.memory_space<vmem>>, %arg2: memref<1x256xf32, #tpu.memory_space<vmem>>, %arg3: memref<2x256xf32, #tpu.memory_space<vmem>>) attributes {dimension_semantics = [#tpu.dimension_semantics<parallel>], iteration_bounds = array<i64: 1>, scalar_prefetch = 0 : i64, scratch_operands = 0 : i64, tpu.core_type = #tpu.core_type<tc>, window_params = [{transform_indices = @transform_0, window_bounds = array<i64: 2, 256>}, {pipeline_mode = #tpu.pipeline_mode<synchronous>, transform_indices = @transform_1, window_bounds = array<i64: 1, 256>}, {transform_indices = @transform_2, window_bounds = array<i64: 2, 256>}]} {
    %c0 = arith.constant 0 : index
    %c0_0 = arith.constant 0 : index
    %0 = vector.load %arg1[%c0, %c0_0] : memref<2x256xf32, #tpu.memory_space<vmem>>, vector<2x256xf32>
    %cst = arith.constant 5.65685415 : f32
    %1 = vector.broadcast %cst : f32 to vector<2x256xf32>
    %2 = arith.mulf %0, %1 : vector<2x256xf32>
    %c0_1 = arith.constant 0 : index
    %c0_2 = arith.constant 0 : index
    %3 = vector.load %arg2[%c0_1, %c0_2] : memref<1x256xf32, #tpu.memory_space<vmem>>, vector<1x256xf32>
    %4 = vector.broadcast %3 : vector<1x256xf32> to vector<2x256xf32>
    %5 = arith.addf %2, %4 : vector<2x256xf32>
    %c0_3 = arith.constant 0 : index
    %c0_4 = arith.constant 0 : index
    %6 = vector.load %arg3[%c0_3, %c0_4] : memref<2x256xf32, #tpu.memory_space<vmem>>, vector<2x256xf32>
    tpu.vector_store %arg3[%c0_3, %c0_4], %5 {strides = array<i32>} : memref<2x256xf32, #tpu.memory_space<vmem>>, vector<2x256xf32>,
    return
  }
  func.func @transform_0(%arg0: i32) -> (i32, i32) {
    %c0_i32 = arith.constant 0 : i32
    %c0_i32_0 = arith.constant 0 : i32
    return %arg0, %c0_i32 : i32, i32
  }
  func.func @transform_1(%arg0: i32) -> (i32, i32) {
    %c0_i32 = arith.constant 0 : i32
    %c0_i32_0 = arith.constant 0 : i32
    %c0_i32_1 = arith.constant 0 : i32
    return %c0_i32, %c0_i32_0 : i32, i32
  }
  func.func @transform_2(%arg0: i32) -> (i32, i32) {
    %c0_i32 = arith.constant 0 : i32
    %c0_i32_0 = arith.constant 0 : i32
    return %arg0, %c0_i32 : i32, i32
  }
}

</mosaic_0001>

<bundles_post_ra>
// kernel: tpu_custom_call.1
= control target key start
LH: loop header
LB: loop body
LE: loop exit
PB: predicated region body
PF: predicated region fallthrough
CT: control target
= control target key end

     0   :  { %7 = vsyncpa [#allocation3], 0  ;;  %s158_s0 = inlined_call_operand.hbm [shape: f32[2,256], index: 0, kind: input, shape index: {}]   ;;  %s159_s1 = inlined_call_operand.vmem [shape: f32[1,256], index: 1, kind: input, shape index: {}]   ;;  %s160_s2 = inlined_call_operand.hbm [shape: f32[2,256], index: 2, kind: output, shape index: {}]  }
   0x1   :  { %8 = vsyncpa [#allocation4], 0  ;;  %s113_s9 = smov [#allocation2]   ;;  %s65_s13 = scalar_lea.hbm %s158_s0, 64 }
   0x2   :  { %s15_s10 = sshll.u32 %s113_s9, 4  ;;  %p66_p0 = scmp.ne.s32.totalorder %s158_s0, %s65_s13  ;;  %s16_s10 = int_to_ptr.vmem [resolvable:$true] %s15_s10 }
   0x3   :  { %p69_p1 = scmp.lt.u32.totalorder %s65_s13, %s158_s0 }
   0x5   :  { %p71_p2 = pnand %p69_p1, %p66_p0 }
   0x7   :  { %74 = shalt.err (!%p71_p2)
}
   0x8   :  { %s75_s18 = scalar_lea.vmem %s16_s10, 64  ;;  %p80_p4 = scmp.lt.s32.totalorder %s16_s10, %s16_s10 }
   0x9   :  { %p76_p3 = scmp.ne.s32.totalorder %s16_s10, %s75_s18  ;;  %p81_p5 = scmp.lt.s32.totalorder %s75_s18, %s75_s18 }
   0xb   :  { %p82_p6 = por %p81_p5, %p80_p4 }
   0xd   :  { %p83_p7 = pnand %p82_p6, %p76_p3 }
   0xf   :  { %86 = shalt.err (!%p83_p7)
}
  0x10   :  { %18 = dma.hbm_to_vmem [thread:$0]  %s158_s0, 64, %s16_s10, [#allocation3]  }
  0x11   :  { %109 = dma.done.wait [#allocation3], 64  }
  0x12   :  { %110 = vsyncadd [#allocation3], 4294967232  ;;  %v28_v0 = vlaneseq  ;;  %v114_v1 = vmov 1983009808   ;;  %v24_v7 = vld [vmem:[#allocation2] sm:$0xf] }
  0x13   :  { %v38_v2 = vunpack.c.l.s4 %v114_v1  ;;  %v26_v8 = vld [vmem:[%s159_s1] sm:$0x3]  ;;  %v25_v12 = vmul.f32 5.656854, %v24_v7  ;;  %s115_s0 = smov [#allocation5]  }
  0x14   :  { %v29_v3 = vshrl.u32 %v28_v0, 7  ;;  %s53_s23 = sshll.u32 %s115_s0, 4  ;;  %s54_s23 = int_to_ptr.vmem [resolvable:$true] %s53_s23 }
  0x15   :  { %v39_v6 = vunpack.c.0.s8 %v38_v2  ;;  %s87_s24 = scalar_lea.vmem %s54_s23, 64  ;;  %p92_p9 = scmp.lt.s32.totalorder %s54_s23, %s54_s23 }
  0x16   :  { %v30_v4 = vsub.s32 0, %v29_v3  ;;  %v34_v5 = vsub.s32 1, %v29_v3  ;;  %p88_p8 = scmp.ne.s32.totalorder %s54_s23, %s87_s24  ;;  %p93_p10 = scmp.lt.s32.totalorder %s87_s24, %s87_s24 }
  0x17   :  { %v42_v11 = vsub.s32 %v39_v6, %v29_v3 }
  0x18   :  { %v31_v9 = vrot.slane %v26_v8, %v30_v4  ;;  %v35_v10 = vrot.slane %v26_v8, %v34_v5  ;;  %p94_p11 = por %p93_p10, %p92_p9 }
  0x1a   :  { %v36_v13 = vcombine.low %v31_v9, %v35_v10  ;;  %p95_p12 = pnand %p94_p11, %p88_p8 }
  0x1c   :  { %v43_v14 = vrot.slane %v36_v13, %v42_v11 }
  0x1e   :  { %v45_v15 = vadd.f32 %v43_v14, %v25_v12 }
  0x20   :  { %46 = vst [vmem:[#allocation5] sm:$0xf] %v45_v15 }
  0x21   :  { %98 = shalt.err (!%p95_p12)
}
  0x22   :  { %s99_s26 = scalar_lea.hbm %s160_s2, 64 }
  0x23   :  { %p100_p13 = scmp.ne.s32.totalorder %s160_s2, %s99_s26  ;;  %p103_p0 = scmp.lt.u32.totalorder %s99_s26, %s160_s2 }
  0x25   :  { %p105_p1 = pnand %p103_p0, %p100_p13 }
  0x27   :  { %108 = shalt.err (!%p105_p1)
}
  0x28   :  { %56 = dma.vmem_to_hbm [thread:$0]  %s54_s23, 64, %s160_s2, [#allocation4]  }
  0x29   :  { %111 = dma.done.wait [#allocation4], 64  }
  0x2a   :  { %112 = vsyncadd [#allocation4], 4294967232 }
  0x2b   :  { %60 = vsyncpa [#allocation3], 1 }
  0x2c   :  { %61 = vsyncpa [#allocation4], 1 }

</bundles_post_ra>
